<compile_context>
chip_gen: v7x
topology: tpu7x:2x2x1
jax: 0.10.0
libtpu: 0.0.40
codegen_flags: <defaults>
</compile_context>

<pallas_src>
import jax
import jax.numpy as jnp
from jax.experimental import pallas as pl
from jax.experimental.pallas import tpu as pltpu


def _make_concat_dma_kernel(channel_sizes):
    """Build a kernel issuing one HBM->HBM DMA per input into its channel slot."""
    offsets = []
    off = 0
    for c in channel_sizes:
        offsets.append(off)
        off += c
    n_in = len(channel_sizes)

    def kernel(*refs):
        # refs = (*in_hbm_refs, out_hbm_ref, dma_sems)
        in_refs = refs[:n_in]
        out_ref = refs[n_in]
        sems = refs[n_in + 1]

        copies = []
        for i, (ref, o, c) in enumerate(zip(in_refs, offsets, channel_sizes)):
            cp = pltpu.make_async_copy(
                ref,                            # (N, C_i, H, W) slab in HBM
                out_ref.at[:, o:o + c, :, :],   # strided window of (N, C_tot, H, W)
                sems.at[i],
            )
            cp.start()
            copies.append(cp)
        # All DMAs are in flight concurrently; now drain them.
        for cp in copies:
            cp.wait()

    return kernel


def concat_pallas(xs, dimension=1):
    """Pallas equivalent of torch.cat(xs, dim=1) for NCHW tensors."""
    assert dimension == 1, "This kernel implements channel-dim (dim=1) concat."
    assert len(xs) >= 1
    n, _, h, w = xs[0].shape
    dtype = xs[0].dtype
    for x in xs:
        assert x.shape[0] == n and x.shape[2] == h and x.shape[3] == w
        assert x.dtype == dtype

    channel_sizes = [int(x.shape[1]) for x in xs]
    c_total = sum(channel_sizes)

    itemsize = jnp.dtype(dtype).itemsize
    total_bytes = sum(int(x.size) for x in xs) * itemsize

    kernel = _make_concat_dma_kernel(channel_sizes)

    return pl.pallas_call(
        kernel,
        out_shape=jax.ShapeDtypeStruct((n, c_total, h, w), dtype),
        # Raw HBM refs everywhere: no auto-DMA, no VMEM tiles, no grid.
        in_specs=[pl.BlockSpec(memory_space=pl.ANY) for _ in xs],
        out_specs=pl.BlockSpec(memory_space=pl.ANY),
        scratch_shapes=[pltpu.SemaphoreType.DMA((len(xs),))],
        # Memory-bound hint so XLA can schedule neighbors around this copy.
        cost_estimate=pl.CostEstimate(
            flops=0, transcendentals=0, bytes_accessed=2 * total_bytes),
    )(*xs)


if __name__ == "__main__":
    key = jax.random.PRNGKey(0)
    k1, k2, k3 = jax.random.split(key, 3)

    # Small NCHW feature maps, as Concat would see in a YOLO neck.
    x1 = jax.random.normal(k1, (2, 4, 16, 16), dtype=jnp.float32)
    x2 = jax.random.normal(k2, (2, 8, 16, 16), dtype=jnp.float32)
    x3 = jax.random.normal(k3, (2, 4, 16, 16), dtype=jnp.float32)

    out = concat_pallas([x1, x2, x3], dimension=1)
    out = jax.block_until_ready(out)

    ref = jnp.concatenate([x1, x2, x3], axis=1)
    assert out.shape == ref.shape, (out.shape, ref.shape)
    assert jnp.allclose(out, ref), "Pallas concat mismatch vs jnp.concatenate"

    print("KERNEL_OK")
</pallas_src>

<mosaic_0001>
module attributes {stable_mosaic.version = 11 : i64} {
  func.func @kernel(%arg0: memref<2x4x16x16xf32, #tpu.memory_space<any>>, %arg1: memref<2x8x16x16xf32, #tpu.memory_space<any>>, %arg2: memref<2x4x16x16xf32, #tpu.memory_space<any>>, %arg3: memref<2x16x16x16xf32, #tpu.memory_space<any>>, %arg4: memref<3x!tpu.dma_semaphore, #tpu.memory_space<semaphore_mem>>) attributes {dimension_semantics = [], scalar_prefetch = 0 : i64, scratch_operands = 1 : i64, tpu.core_type = #tpu.core_type<tc>} {
    %c0_i32 = arith.constant 0 : i32
    %c0_i32_0 = arith.constant 0 : i32
    %c0_i32_1 = arith.constant 0 : i32
    %c0_i32_2 = arith.constant 0 : i32
    %c0_i32_3 = arith.constant 0 : i32
    %0 = tpu.memref_slice %arg3[%c0_i32_0, %c0_i32_1, %c0_i32_2, %c0_i32_3] : memref<2x16x16x16xf32, #tpu.memory_space<any>> -> memref<2x4x16x16xf32, #tpu.memory_space<any>>
    %1 = tpu.memref_slice %arg4[%c0_i32] : memref<3x!tpu.dma_semaphore, #tpu.memory_space<semaphore_mem>> -> memref<1x!tpu.dma_semaphore, #tpu.memory_space<semaphore_mem>>
    %2 = tpu.memref_squeeze %1 : memref<1x!tpu.dma_semaphore, #tpu.memory_space<semaphore_mem>> -> memref<!tpu.dma_semaphore, #tpu.memory_space<semaphore_mem>>
    tpu.enqueue_dma source(%arg0 : memref<2x4x16x16xf32, #tpu.memory_space<any>>) target(%0 : memref<2x4x16x16xf32, #tpu.memory_space<any>>) target_semaphore(%2 : memref<!tpu.dma_semaphore, #tpu.memory_space<semaphore_mem>>)
    %c1_i32 = arith.constant 1 : i32
    %c0_i32_4 = arith.constant 0 : i32
    %c4_i32 = arith.constant 4 : i32
    %c0_i32_5 = arith.constant 0 : i32
    %c0_i32_6 = arith.constant 0 : i32
    %3 = tpu.memref_slice %arg3[%c0_i32_4, %c4_i32, %c0_i32_5, %c0_i32_6] : memref<2x16x16x16xf32, #tpu.memory_space<any>> -> memref<2x8x16x16xf32, #tpu.memory_space<any>>
    %4 = tpu.memref_slice %arg4[%c1_i32] : memref<3x!tpu.dma_semaphore, #tpu.memory_space<semaphore_mem>> -> memref<1x!tpu.dma_semaphore, #tpu.memory_space<semaphore_mem>>
    %5 = tpu.memref_squeeze %4 : memref<1x!tpu.dma_semaphore, #tpu.memory_space<semaphore_mem>> -> memref<!tpu.dma_semaphore, #tpu.memory_space<semaphore_mem>>
    tpu.enqueue_dma source(%arg1 : memref<2x8x16x16xf32, #tpu.memory_space<any>>) target(%3 : memref<2x8x16x16xf32, #tpu.memory_space<any>>) target_semaphore(%5 : memref<!tpu.dma_semaphore, #tpu.memory_space<semaphore_mem>>)
    %c2_i32 = arith.constant 2 : i32
    %c0_i32_7 = arith.constant 0 : i32
    %c12_i32 = arith.constant 12 : i32
    %c0_i32_8 = arith.constant 0 : i32
    %c0_i32_9 = arith.constant 0 : i32
    %6 = tpu.memref_slice %arg3[%c0_i32_7, %c12_i32, %c0_i32_8, %c0_i32_9] : memref<2x16x16x16xf32, #tpu.memory_space<any>> -> memref<2x4x16x16xf32, #tpu.memory_space<any>>
    %7 = tpu.memref_slice %arg4[%c2_i32] : memref<3x!tpu.dma_semaphore, #tpu.memory_space<semaphore_mem>> -> memref<1x!tpu.dma_semaphore, #tpu.memory_space<semaphore_mem>>
    %8 = tpu.memref_squeeze %7 : memref<1x!tpu.dma_semaphore, #tpu.memory_space<semaphore_mem>> -> memref<!tpu.dma_semaphore, #tpu.memory_space<semaphore_mem>>
    tpu.enqueue_dma source(%arg2 : memref<2x4x16x16xf32, #tpu.memory_space<any>>) target(%6 : memref<2x4x16x16xf32, #tpu.memory_space<any>>) target_semaphore(%8 : memref<!tpu.dma_semaphore, #tpu.memory_space<semaphore_mem>>)
    %c0_i32_10 = arith.constant 0 : i32
    %c0_i32_11 = arith.constant 0 : i32
    %c0_i32_12 = arith.constant 0 : i32
    %c0_i32_13 = arith.constant 0 : i32
    %c0_i32_14 = arith.constant 0 : i32
    %9 = tpu.memref_slice %arg3[%c0_i32_11, %c0_i32_12, %c0_i32_13, %c0_i32_14] : memref<2x16x16x16xf32, #tpu.memory_space<any>> -> memref<2x4x16x16xf32, #tpu.memory_space<any>>
    %10 = tpu.memref_slice %arg4[%c0_i32_10] : memref<3x!tpu.dma_semaphore, #tpu.memory_space<semaphore_mem>> -> memref<1x!tpu.dma_semaphore, #tpu.memory_space<semaphore_mem>>
    %11 = tpu.memref_squeeze %10 : memref<1x!tpu.dma_semaphore, #tpu.memory_space<semaphore_mem>> -> memref<!tpu.dma_semaphore, #tpu.memory_space<semaphore_mem>>
    tpu.wait_dma2 semaphore(%11 : memref<!tpu.dma_semaphore, #tpu.memory_space<semaphore_mem>>) src(%arg0 : memref<2x4x16x16xf32, #tpu.memory_space<any>>) dst(%9 : memref<2x4x16x16xf32, #tpu.memory_space<any>>)
    %c1_i32_15 = arith.constant 1 : i32
    %c0_i32_16 = arith.constant 0 : i32
    %c4_i32_17 = arith.constant 4 : i32
    %c0_i32_18 = arith.constant 0 : i32
    %c0_i32_19 = arith.constant 0 : i32
    %12 = tpu.memref_slice %arg3[%c0_i32_16, %c4_i32_17, %c0_i32_18, %c0_i32_19] : memref<2x16x16x16xf32, #tpu.memory_space<any>> -> memref<2x8x16x16xf32, #tpu.memory_space<any>>
    %13 = tpu.memref_slice %arg4[%c1_i32_15] : memref<3x!tpu.dma_semaphore, #tpu.memory_space<semaphore_mem>> -> memref<1x!tpu.dma_semaphore, #tpu.memory_space<semaphore_mem>>
    %14 = tpu.memref_squeeze %13 : memref<1x!tpu.dma_semaphore, #tpu.memory_space<semaphore_mem>> -> memref<!tpu.dma_semaphore, #tpu.memory_space<semaphore_mem>>
    tpu.wait_dma2 semaphore(%14 : memref<!tpu.dma_semaphore, #tpu.memory_space<semaphore_mem>>) src(%arg1 : memref<2x8x16x16xf32, #tpu.memory_space<any>>) dst(%12 : memref<2x8x16x16xf32, #tpu.memory_space<any>>)
    %c2_i32_20 = arith.constant 2 : i32
    %c0_i32_21 = arith.constant 0 : i32
    %c12_i32_22 = arith.constant 12 : i32
    %c0_i32_23 = arith.constant 0 : i32
    %c0_i32_24 = arith.constant 0 : i32
    %15 = tpu.memref_slice %arg3[%c0_i32_21, %c12_i32_22, %c0_i32_23, %c0_i32_24] : memref<2x16x16x16xf32, #tpu.memory_space<any>> -> memref<2x4x16x16xf32, #tpu.memory_space<any>>
    %16 = tpu.memref_slice %arg4[%c2_i32_20] : memref<3x!tpu.dma_semaphore, #tpu.memory_space<semaphore_mem>> -> memref<1x!tpu.dma_semaphore, #tpu.memory_space<semaphore_mem>>
    %17 = tpu.memref_squeeze %16 : memref<1x!tpu.dma_semaphore, #tpu.memory_space<semaphore_mem>> -> memref<!tpu.dma_semaphore, #tpu.memory_space<semaphore_mem>>
    tpu.wait_dma2 semaphore(%17 : memref<!tpu.dma_semaphore, #tpu.memory_space<semaphore_mem>>) src(%arg2 : memref<2x4x16x16xf32, #tpu.memory_space<any>>) dst(%15 : memref<2x4x16x16xf32, #tpu.memory_space<any>>)
    return
  }
}

</mosaic_0001>

<bundles_post_ra>
// kernel: tpu_custom_call.1
= control target key start
LH: loop header
LB: loop body
LE: loop exit
PB: predicated region body
PF: predicated region fallthrough
CT: control target
= control target key end

     0   :  { %s122_s12 = smov 1024   ;;  %s123_s13 = smov 4096   ;;  %s172_s0 = inlined_call_operand.hbm [shape: f32[2,4,16,16], index: 0, kind: input, shape index: {}]   ;;  %s173_s1 = inlined_call_operand.hbm [shape: f32[2,8,16,16], index: 1, kind: input, shape index: {}]   ;;  %s174_s2 = inlined_call_operand.hbm [shape: f32[2,4,16,16], index: 2, kind: input, shape index: {}]   ;;  %s175_s3 = inlined_call_operand.hbm [shape: f32[2,16,16,16], index: 3, kind: output, shape index: {}]  }
   0x1   :  { %20 = sst [smem:[#allocation4]] %s122_s12  ;;  %s124_s14 = smov 64  }
   0x2   :  { %22 = sst [smem:[#allocation4 + $0x1]] %s123_s13  ;;  %s125_s15 = smov [#allocation2]  }
   0x3   :  { %24 = sst [smem:[#allocation4 + $0x2]] %s124_s14  ;;  %s126_s16 = smov [#allocation3]  }
   0x4   :  { %s127_s17 = smov 0   ;;  %s128_s22 = smov 2048  }
   0x5   :  { %26 = dma.general %s172_s0, 2048, %s175_s3, %s125_s15, %s126_s16, [#allocation4], %s127_s17, 0  }
   0x6   :  { %41 = sst [smem:[#allocation6]] %s128_s22  ;;  %s27_s25 = scalar_lea.hbm %s175_s3, 1024 }
   0x7   :  { %43 = sst [smem:[#allocation6 + $0x1]] %s123_s13  ;;  %s129_s26 = smov 128  }
   0x8   :  { %45 = sst [smem:[#allocation6 + $0x2]] %s129_s26  ;;  %s48_s29 = scalar_lea.hbm %s175_s3, 3072 }
   0x9   :  { %s130_s30 = smov [#allocation2 + $0x1]   ;;  %s131_s4 = smov [#allocation5]  }
   0xa   :  { %47 = dma.general %s173_s1, 4096, %s27_s25, %s130_s30, %s131_s4, [#allocation6], %s127_s17, 0  }
   0xb   :  { %62 = sst [smem:[#allocation8]] %s122_s12  ;;  %s132_s0 = smov [#allocation2 + $0x2]  }
   0xc   :  { %64 = sst [smem:[#allocation8 + $0x1]] %s123_s13  ;;  %s133_s7 = smov [#allocation7]  }
   0xd   :  { %66 = sst [smem:[#allocation8 + $0x2]] %s124_s14 }
   0xe   :  { %68 = dma.general %s174_s2, 2048, %s48_s29, %s132_s0, %s133_s7, [#allocation8], %s127_s17, 0  }
   0xf   :  { %116 = dma.done.wait [#allocation2], 2048 }
  0x10   :  { %117 = vsyncadd [#allocation2], 4294965248 }
  0x11   :  { %118 = dma.done.wait [#allocation2 + $0x1], 4096 }
  0x12   :  { %119 = vsyncadd [#allocation2 + $0x1], 4294963200 }
  0x13   :  { %120 = dma.done.wait [#allocation2 + $0x2], 2048 }
  0x14   :  { %121 = vsyncadd [#allocation2 + $0x2], 4294965248 }
  0x15   :  { %81 = vsyncmov [#allocation2] }
  0x18   :  { %s82_s3 = vpop.sfrf %81 }
  0x19   :  { %p101_p0 = scmp.ne.s32.totalorder %s82_s3, 0 }
  0x1b   :  { %86 = shalt.err (%p101_p0)  }
  0x1c   :  { %88 = vsyncmov [#allocation2 + $0x1] }
  0x1f   :  { %s89_s1 = vpop.sfrf %88 }
  0x20   :  { %p102_p1 = scmp.ne.s32.totalorder %s89_s1, 0 }
  0x22   :  { %93 = shalt.err (%p102_p1)  }
  0x23   :  { %95 = vsyncmov [#allocation2 + $0x2] }
  0x26   :  { %s96_s10 = vpop.sfrf %95 }
  0x27   :  { %p103_p2 = scmp.ne.s32.totalorder %s96_s10, 0 }
  0x29   :  { %100 = shalt.err (%p103_p2)  }

</bundles_post_ra>
